<compile_context>
chip_gen: v5e
topology: v5e:2x2
jax: 0.10.0
libtpu: 0.0.40
codegen_flags: <defaults>
</compile_context>

<pallas_src>
import math
import functools

import jax
import jax.numpy as jnp
from jax.experimental import pallas as pl
from jax.experimental.pallas import tpu as pltpu

LN_EPS = 1e-12


# ---------------------------------------------------------------------------
# In-kernel math helpers (f32 math).
# ---------------------------------------------------------------------------
def _erf_approx(x):
    # Abramowitz & Stegun 7.1.26 (max abs err ~1.5e-7); avoids relying on an
    # erf lowering inside Mosaic.
    p = 0.3275911
    a1, a2, a3, a4, a5 = (0.254829592, -0.284496736, 1.421413741,
                          -1.453152027, 1.061405429)
    ax = jnp.abs(x)
    t = 1.0 / (1.0 + p * ax)
    poly = t * (a1 + t * (a2 + t * (a3 + t * (a4 + t * a5))))
    y = 1.0 - poly * jnp.exp(-ax * ax)
    return jnp.where(x >= 0, y, -y)


def _gelu(x):
    # BERT's exact-erf gelu: x * 0.5 * (1 + erf(x / sqrt(2)))
    return x * 0.5 * (1.0 + _erf_approx(x * (1.0 / math.sqrt(2.0))))


def _layernorm(x, gamma, beta, eps):
    mu = jnp.mean(x, axis=-1, keepdims=True)
    xc = x - mu
    var = jnp.mean(xc * xc, axis=-1, keepdims=True)
    return xc * jax.lax.rsqrt(var + eps) * gamma + beta


# ---------------------------------------------------------------------------
# Kernel 1: fused K/V projection  (grid over batch)
# ---------------------------------------------------------------------------
def _kv_proj_kernel(x_ref, wkv_ref, bkv_ref, k_ref, v_ref, *, hidden, compute_dtype):
    cdt = compute_dtype
    x = x_ref[0].astype(cdt)                                   # (S, H)
    kv = jnp.dot(x, wkv_ref[...].astype(cdt),
                 preferred_element_type=jnp.float32) + bkv_ref[...]   # (S, 2H) f32
    k_ref[0] = kv[:, :hidden].astype(k_ref.dtype)
    v_ref[0] = kv[:, hidden:].astype(v_ref.dtype)


def kv_projection(x, wkv, bkv, *, compute_dtype, kv_dtype):
    B, S, H = x.shape
    kernel = functools.partial(_kv_proj_kernel, hidden=H, compute_dtype=compute_dtype)
    grid_spec = pltpu.PrefetchScalarGridSpec(
        num_scalar_prefetch=0, grid=(B,),
        in_specs=[pl.BlockSpec((1, S, H), lambda b: (b, 0, 0)),
                  pl.BlockSpec((H, 2 * H), lambda b: (0, 0)),
                  pl.BlockSpec((1, 2 * H), lambda b: (0, 0))],
        out_specs=[pl.BlockSpec((1, S, H), lambda b: (b, 0, 0)),
                   pl.BlockSpec((1, S, H), lambda b: (b, 0, 0))])
    return pl.pallas_call(
        kernel,
        out_shape=(jax.ShapeDtypeStruct((B, S, H), kv_dtype),
                   jax.ShapeDtypeStruct((B, S, H), kv_dtype)),
        grid_spec=grid_spec,
        compiler_params=pltpu.CompilerParams(dimension_semantics=("parallel",)),
    )(x, wkv, bkv)


# ---------------------------------------------------------------------------
# Kernel 2: attention core  (grid over (batch, Sq tiles))
# ---------------------------------------------------------------------------
def _attention_kernel(xq_ref, k_ref, v_ref, wq_ref, bq_ref, o_ref, *,
                      num_heads, head_dim, compute_dtype):
    cdt = compute_dtype
    xq = xq_ref[0]                                             # (tq, H)
    # Q projection; 1/sqrt(head_dim) was folded into Wq/bq offline.
    q = jnp.dot(xq.astype(cdt), wq_ref[...].astype(cdt),
                preferred_element_type=jnp.float32) + bq_ref[...]     # (tq, H) f32
    k = k_ref[0]                                               # (Sk, H)
    v = v_ref[0]

    parts = []
    for h in range(num_heads):                                 # static, unrolled
        lo = h * head_dim
        q_h = q[:, lo:lo + head_dim].astype(cdt)               # (tq, dH)
        k_h = k[:, lo:lo + head_dim].astype(cdt)               # (Sk, dH)
        v_h = v[:, lo:lo + head_dim].astype(cdt)               # (Sk, dH)
        # scores = q_h @ k_h^T  (contract head_dim; no explicit transpose)
        scores = jax.lax.dot_general(q_h, k_h, (((1,), (1,)), ((), ())),
                                     preferred_element_type=jnp.float32)  # (tq, Sk)
        # no attention mask: the module calls BertAttention with mask=None
        m = jnp.max(scores, axis=-1, keepdims=True)
        e = jnp.exp(scores - m)
        denom = jnp.sum(e, axis=-1, keepdims=True)
        probs = e * pl.reciprocal(denom, approx=True)          # EUP vrcp
        ctx_h = jnp.dot(probs.astype(cdt), v_h,
                        preferred_element_type=jnp.float32)    # (tq, dH)
        parts.append(ctx_h)
    o_ref[0] = jnp.concatenate(parts, axis=-1).astype(o_ref.dtype)


def attention(x, k, v, wq_scaled, bq_scaled, *, num_heads, tq, compute_dtype):
    B, S, H = x.shape
    head_dim = H // num_heads
    n_q = S // tq
    kernel = functools.partial(_attention_kernel, num_heads=num_heads,
                               head_dim=head_dim, compute_dtype=compute_dtype)
    grid_spec = pltpu.PrefetchScalarGridSpec(
        num_scalar_prefetch=0, grid=(B, n_q),
        in_specs=[pl.BlockSpec((1, tq, H), lambda b, qi: (b, qi, 0)),
                  pl.BlockSpec((1, S, H), lambda b, qi: (b, 0, 0)),
                  pl.BlockSpec((1, S, H), lambda b, qi: (b, 0, 0)),
                  pl.BlockSpec((H, H), lambda b, qi: (0, 0)),
                  pl.BlockSpec((1, H), lambda b, qi: (0, 0))],
        out_specs=pl.BlockSpec((1, tq, H), lambda b, qi: (b, qi, 0)))
    return pl.pallas_call(
        kernel,
        out_shape=jax.ShapeDtypeStruct((B, S, H), x.dtype),
        grid_spec=grid_spec,
        compiler_params=pltpu.CompilerParams(
            dimension_semantics=("parallel", "parallel")),
    )(x, k, v, wq_scaled, bq_scaled)


# ---------------------------------------------------------------------------
# Kernel 3: dense + residual + LayerNorm  (row tiled over B*S)
# ---------------------------------------------------------------------------
def _dense_residual_ln_kernel(h_ref, res_ref, w_ref, b_ref, g_ref, bb_ref, o_ref, *,
                              eps, compute_dtype):
    cdt = compute_dtype
    y = jnp.dot(h_ref[...].astype(cdt), w_ref[...].astype(cdt),
                preferred_element_type=jnp.float32) + b_ref[...]
    y = y + res_ref[...].astype(jnp.float32)
    o_ref[...] = _layernorm(y, g_ref[...], bb_ref[...], eps).astype(o_ref.dtype)


def dense_residual_layernorm(h, residual, w, b, gamma, beta, *, tm, compute_dtype):
    B, S, Hin = h.shape
    H = residual.shape[-1]
    R = B * S
    h2 = h.reshape(R, Hin)
    r2 = residual.reshape(R, H)
    kernel = functools.partial(_dense_residual_ln_kernel, eps=LN_EPS,
                               compute_dtype=compute_dtype)
    grid_spec = pltpu.PrefetchScalarGridSpec(
        num_scalar_prefetch=0, grid=(R // tm,),
        in_specs=[pl.BlockSpec((tm, Hin), lambda i: (i, 0)),
                  pl.BlockSpec((tm, H), lambda i: (i, 0)),
                  pl.BlockSpec((Hin, H), lambda i: (0, 0)),
                  pl.BlockSpec((1, H), lambda i: (0, 0)),
                  pl.BlockSpec((1, H), lambda i: (0, 0)),
                  pl.BlockSpec((1, H), lambda i: (0, 0))],
        out_specs=pl.BlockSpec((tm, H), lambda i: (i, 0)))
    out = pl.pallas_call(
        kernel,
        out_shape=jax.ShapeDtypeStruct((R, H), h.dtype),
        grid_spec=grid_spec,
        compiler_params=pltpu.CompilerParams(dimension_semantics=("parallel",)),
    )(h2, r2, w, b, gamma, beta)
    return out.reshape(B, S, H)


# ---------------------------------------------------------------------------
# Kernel 4: FFN (intermediate gelu + output dense + residual + LayerNorm)
# ---------------------------------------------------------------------------
def _ffn_ln_kernel(y_ref, wi_ref, bi_ref, wo_ref, bo_ref, g_ref, bb_ref, o_ref, *,
                   eps, compute_dtype):
    cdt = compute_dtype
    y = y_ref[...].astype(jnp.float32)                         # (tm, H)
    inter = jnp.dot(y.astype(cdt), wi_ref[...].astype(cdt),
                    preferred_element_type=jnp.float32) + bi_ref[...]  # (tm, I)
    inter = _gelu(inter)
    z = jnp.dot(inter.astype(cdt), wo_ref[...].astype(cdt),
                preferred_element_type=jnp.float32) + bo_ref[...] + y
    o_ref[...] = _layernorm(z, g_ref[...], bb_ref[...], eps).astype(o_ref.dtype)


def ffn_layernorm(y, wi, bi, wo, bo, gamma, beta, *, tm, compute_dtype):
    B, S, H = y.shape
    inter_dim = wi.shape[-1]
    R = B * S
    y2 = y.reshape(R, H)
    kernel = functools.partial(_ffn_ln_kernel, eps=LN_EPS, compute_dtype=compute_dtype)
    grid_spec = pltpu.PrefetchScalarGridSpec(
        num_scalar_prefetch=0, grid=(R // tm,),
        in_specs=[pl.BlockSpec((tm, H), lambda i: (i, 0)),
                  pl.BlockSpec((H, inter_dim), lambda i: (0, 0)),
                  pl.BlockSpec((1, inter_dim), lambda i: (0, 0)),
                  pl.BlockSpec((inter_dim, H), lambda i: (0, 0)),
                  pl.BlockSpec((1, H), lambda i: (0, 0)),
                  pl.BlockSpec((1, H), lambda i: (0, 0)),
                  pl.BlockSpec((1, H), lambda i: (0, 0))],
        out_specs=pl.BlockSpec((tm, H), lambda i: (i, 0)))
    out = pl.pallas_call(
        kernel,
        out_shape=jax.ShapeDtypeStruct((R, H), y.dtype),
        grid_spec=grid_spec,
        compiler_params=pltpu.CompilerParams(dimension_semantics=("parallel",)),
    )(y2, wi, bi, wo, bo, gamma, beta)
    return out.reshape(B, S, H)


# ---------------------------------------------------------------------------
# Kernel 5: mean-pool + weight-normed classifier (single invocation, no grid)
# ---------------------------------------------------------------------------
def _classifier_kernel(x_ref, w1_ref, b1_ref, w2_ref, b2_ref, o_ref, *, compute_dtype):
    cdt = compute_dtype
    rows = []
    for b in range(x_ref.shape[0]):                            # static batch loop
        rows.append(jnp.mean(x_ref[b].astype(jnp.float32), axis=0, keepdims=True))
    pooled = jnp.concatenate(rows, axis=0)                     # (B, H)
    h1 = jnp.dot(pooled.astype(cdt), w1_ref[...].astype(cdt),
                 preferred_element_type=jnp.float32) + b1_ref[...]
    h1 = jnp.maximum(h1, 0.0)                                  # ReLU (Dropout = identity)
    logits = jnp.dot(h1.astype(cdt), w2_ref[...].astype(cdt),
                     preferred_element_type=jnp.float32) + b2_ref[...]
    o_ref[...] = logits.astype(o_ref.dtype)


def classifier(x, w1, b1, w2, b2, *, compute_dtype):
    B = x.shape[0]
    A = w2.shape[-1]
    kernel = functools.partial(_classifier_kernel, compute_dtype=compute_dtype)
    return pl.pallas_call(
        kernel, out_shape=jax.ShapeDtypeStruct((B, A), x.dtype),
    )(x, w1, b1, w2, b2)


# ---------------------------------------------------------------------------
# Full forward (QuestionAnswerAdditional)
# ---------------------------------------------------------------------------
def prepare_kernel_params(raw_layers, cls, *, num_heads):
    layers = []
    for rl in raw_layers:
        H = rl["wq"].shape[0]
        scale = 1.0 / math.sqrt(H // num_heads)
        layers.append(dict(
            wq_s=rl["wq"] * scale, bq_s=rl["bq"] * scale,       # scale folded offline
            wkv=jnp.concatenate([rl["wk"], rl["wv"]], axis=1),  # fused K/V weight
            bkv=jnp.concatenate([rl["bk"], rl["bv"]], axis=1),
            wao=rl["wao"], bao=rl["bao"],
            wi=rl["wi"], bi=rl["bi"], wo=rl["wo"], bo=rl["bo"],
            ln1_g=rl["ln1_g"], ln1_b=rl["ln1_b"],
            ln2_g=rl["ln2_g"], ln2_b=rl["ln2_b"]))
    # weight_norm(dim=None): W_eff = g * v / ||v||_F (scalar g) — folded offline.
    w1 = cls["g1"] * cls["v1"] / jnp.linalg.norm(cls["v1"])
    w2 = cls["g2"] * cls["v2"] / jnp.linalg.norm(cls["v2"])
    return dict(layers=layers, cls_w1=w1, cls_b1=cls["b1"],
                cls_w2=w2, cls_b2=cls["b2"])


def question_answer_additional_forward(q_emb, kparams, *, num_heads, tq, tm,
                                       compute_dtype=jnp.float32):
    x = q_emb
    kv_dtype = q_emb.dtype if compute_dtype == jnp.float32 else compute_dtype
    for lp in kparams["layers"]:
        k, v = kv_projection(x, lp["wkv"], lp["bkv"],
                             compute_dtype=compute_dtype, kv_dtype=kv_dtype)
        attn = attention(x, k, v, lp["wq_s"], lp["bq_s"],
                         num_heads=num_heads, tq=tq, compute_dtype=compute_dtype)
        y = dense_residual_layernorm(attn, x, lp["wao"], lp["bao"],
                                     lp["ln1_g"], lp["ln1_b"],
                                     tm=tm, compute_dtype=compute_dtype)
        x = ffn_layernorm(y, lp["wi"], lp["bi"], lp["wo"], lp["bo"],
                          lp["ln2_g"], lp["ln2_b"],
                          tm=tm, compute_dtype=compute_dtype)
    return classifier(x, kparams["cls_w1"], kparams["cls_b1"],
                      kparams["cls_w2"], kparams["cls_b2"],
                      compute_dtype=compute_dtype)


# ---------------------------------------------------------------------------
# Pure-JAX reference (mirrors the PyTorch module, eval mode)
# ---------------------------------------------------------------------------
def _reference_forward(q_emb, raw_layers, cls, num_heads):
    def ln(t, g, b):
        mu = t.mean(-1, keepdims=True)
        var = ((t - mu) ** 2).mean(-1, keepdims=True)
        return (t - mu) / jnp.sqrt(var + LN_EPS) * g + b

    def gelu(t):
        return t * 0.5 * (1.0 + jax.scipy.special.erf(t / math.sqrt(2.0)))

    x = q_emb
    for rl in raw_layers:
        B, S, H = x.shape
        dH = H // num_heads

        def split(t):
            return t.reshape(B, S, num_heads, dH).transpose(0, 2, 1, 3)

        q = split(x @ rl["wq"] + rl["bq"])
        k = split(x @ rl["wk"] + rl["bk"])
        v = split(x @ rl["wv"] + rl["bv"])
        scores = q @ k.transpose(0, 1, 3, 2) / math.sqrt(dH)
        probs = jax.nn.softmax(scores, axis=-1)
        ctx = (probs @ v).transpose(0, 2, 1, 3).reshape(B, S, H)
        att = ln(ctx @ rl["wao"] + rl["bao"] + x, rl["ln1_g"], rl["ln1_b"])
        inter = gelu(att @ rl["wi"] + rl["bi"])
        x = ln(inter @ rl["wo"] + rl["bo"] + att, rl["ln2_g"], rl["ln2_b"])

    pooled = x.mean(axis=1)
    w1 = cls["g1"] * cls["v1"] / jnp.linalg.norm(cls["v1"])
    w2 = cls["g2"] * cls["v2"] / jnp.linalg.norm(cls["v2"])
    h1 = jax.nn.relu(pooled @ w1 + cls["b1"])
    return h1 @ w2 + cls["b2"]


if __name__ == "__main__":
    # Small, config-consistent shapes: hidden=128, 8 heads (head_dim=16),
    # intermediate=256, 3 layers, 128 answer candidates, batch=2, seq=16.
    B, S = 2, 16
    H, NUM_HEADS = 128, 8
    INTER = 256
    NUM_ANSWERS = 128
    NUM_LAYERS = 3
    TQ, TM = 8, 8

    root = jax.random.PRNGKey(0)
    k_emb, k_layers, k_cls = jax.random.split(root, 3)
    q_emb = jax.random.normal(k_emb, (B, S, H), jnp.float32)

    def linear_init(key, fan_in, fan_out):
        kw, kb = jax.random.split(key)
        bound = 1.0 / math.sqrt(fan_in)
        w = jax.random.uniform(kw, (fan_in, fan_out), jnp.float32, -bound, bound)
        b = jax.random.uniform(kb, (1, fan_out), jnp.float32, -bound, bound)
        return w, b

    raw_layers = []
    for lk in jax.random.split(k_layers, NUM_LAYERS):
        ks = jax.random.split(lk, 10)
        wq, bq = linear_init(ks[0], H, H)
        wk, bk = linear_init(ks[1], H, H)
        wv, bv = linear_init(ks[2], H, H)
        wao, bao = linear_init(ks[3], H, H)
        wi, bi = linear_init(ks[4], H, INTER)
        wo, bo = linear_init(ks[5], INTER, H)
        ln1_g = 1.0 + 0.1 * jax.random.normal(ks[6], (1, H), jnp.float32)
        ln1_b = 0.1 * jax.random.normal(ks[7], (1, H), jnp.float32)
        ln2_g = 1.0 + 0.1 * jax.random.normal(ks[8], (1, H), jnp.float32)
        ln2_b = 0.1 * jax.random.normal(ks[9], (1, H), jnp.float32)
        raw_layers.append(dict(wq=wq, bq=bq, wk=wk, bk=bk, wv=wv, bv=bv,
                               wao=wao, bao=bao, wi=wi, bi=bi, wo=wo, bo=bo,
                               ln1_g=ln1_g, ln1_b=ln1_b, ln2_g=ln2_g, ln2_b=ln2_b))

    kc1, kc2 = jax.random.split(k_cls)
    v1, b1 = linear_init(kc1, H, 2 * H)
    v2, b2 = linear_init(kc2, 2 * H, NUM_ANSWERS)
    cls = dict(v1=v1, b1=b1, g1=jnp.linalg.norm(v1),   # weight_norm init: g = ||v||_F
               v2=v2, b2=b2, g2=jnp.linalg.norm(v2))

    kparams = prepare_kernel_params(raw_layers, cls, num_heads=NUM_HEADS)
    ref = _reference_forward(q_emb, raw_layers, cls, NUM_HEADS)

    # f32 path
    out_f32 = question_answer_additional_forward(
        q_emb, kparams, num_heads=NUM_HEADS, tq=TQ, tm=TM,
        compute_dtype=jnp.float32)
    out_f32 = jax.block_until_ready(out_f32)
    assert out_f32.shape == (B, NUM_ANSWERS)
    assert jnp.allclose(out_f32, ref, atol=2e-2, rtol=2e-2), "f32 mismatch vs reference"

    # bf16-MXU-operand path (f32 accumulation, f32 softmax/LayerNorm math)
    out_bf16 = question_answer_additional_forward(
        q_emb, kparams, num_heads=NUM_HEADS, tq=TQ, tm=TM,
        compute_dtype=jnp.bfloat16)
    out_bf16 = jax.block_until_ready(out_bf16)
    rel = jnp.linalg.norm(out_bf16 - ref) / jnp.linalg.norm(ref)
    assert rel < 0.1, "bf16 mismatch vs reference"

    print("KERNEL_OK")
</pallas_src>

<mosaic_0001>
module attributes {stable_mosaic.version = 11 : i64} {
  func.func @_kv_proj_kernel(%arg0: i32, %arg1: memref<1x16x128xf32, #tpu.memory_space<vmem>>, %arg2: memref<128x256xf32, #tpu.memory_space<vmem>>, %arg3: memref<1x256xf32, #tpu.memory_space<vmem>>, %arg4: memref<1x16x128xf32, #tpu.memory_space<vmem>>, %arg5: memref<1x16x128xf32, #tpu.memory_space<vmem>>) attributes {dimension_semantics = [#tpu.dimension_semantics<parallel>], iteration_bounds = array<i64: 2>, scalar_prefetch = 0 : i64, scratch_operands = 0 : i64, tpu.core_type = #tpu.core_type<tc>, window_params = [{transform_indices = @transform_0, window_bounds = array<i64: 1, 16, 128>}, {pipeline_mode = #tpu.pipeline_mode<synchronous>, transform_indices = @transform_1, window_bounds = array<i64: 128, 256>}, {pipeline_mode = #tpu.pipeline_mode<synchronous>, transform_indices = @transform_2, window_bounds = array<i64: 1, 256>}, {transform_indices = @transform_3, window_bounds = array<i64: 1, 16, 128>}, {transform_indices = @transform_4, window_bounds = array<i64: 1, 16, 128>}]} {
    %c0 = arith.constant 0 : index
    %c0_0 = arith.constant 0 : index
    %c0_1 = arith.constant 0 : index
    %0 = vector.load %arg1[%c0, %c0_0, %c0_1] : memref<1x16x128xf32, #tpu.memory_space<vmem>>, vector<1x16x128xf32>
    %1 = vector.shape_cast %0 : vector<1x16x128xf32> to vector<16x128xf32>
    %c0_2 = arith.constant 0 : index
    %c0_3 = arith.constant 0 : index
    %2 = vector.load %arg2[%c0_2, %c0_3] : memref<128x256xf32, #tpu.memory_space<vmem>>, vector<128x256xf32>
    %cst = arith.constant dense<0.000000e+00> : vector<16x256xf32>
    %3 = tpu.matmul %1, %2, %cst {dimension_numbers = #tpu.dot_dimension_numbers<[1], [0], [0], [1], [0, 0, 1, 1], [], []>} : vector<16x128xf32>, vector<128x256xf32>, vector<16x256xf32> -> vector<16x256xf32>
    %c0_4 = arith.constant 0 : index
    %c0_5 = arith.constant 0 : index
    %4 = vector.load %arg3[%c0_4, %c0_5] : memref<1x256xf32, #tpu.memory_space<vmem>>, vector<1x256xf32>
    %5 = vector.broadcast %4 : vector<1x256xf32> to vector<16x256xf32>
    %6 = arith.addf %3, %5 : vector<16x256xf32>
    %7 = vector.extract_strided_slice %6 {offsets = [0, 0], sizes = [16, 128], strides = [1, 1]} : vector<16x256xf32> to vector<16x128xf32>
    %c0_6 = arith.constant 0 : index
    %c0_7 = arith.constant 0 : index
    %c0_8 = arith.constant 0 : index
    %8 = vector.load %arg4[%c0_6, %c0_7, %c0_8] : memref<1x16x128xf32, #tpu.memory_space<vmem>>, vector<1x16x128xf32>
    %9 = vector.shape_cast %8 : vector<1x16x128xf32> to vector<16x128xf32>
    %10 = vector.shape_cast %7 : vector<16x128xf32> to vector<1x16x128xf32>
    tpu.vector_store %arg4[%c0_6, %c0_7, %c0_8], %10 {strides = array<i32>} : memref<1x16x128xf32, #tpu.memory_space<vmem>>, vector<1x16x128xf32>,
    %11 = vector.extract_strided_slice %6 {offsets = [0, 128], sizes = [16, 128], strides = [1, 1]} : vector<16x256xf32> to vector<16x128xf32>
    %c0_9 = arith.constant 0 : index
    %c0_10 = arith.constant 0 : index
    %c0_11 = arith.constant 0 : index
    %12 = vector.load %arg5[%c0_9, %c0_10, %c0_11] : memref<1x16x128xf32, #tpu.memory_space<vmem>>, vector<1x16x128xf32>
    %13 = vector.shape_cast %12 : vector<1x16x128xf32> to vector<16x128xf32>
    %14 = vector.shape_cast %11 : vector<16x128xf32> to vector<1x16x128xf32>
    tpu.vector_store %arg5[%c0_9, %c0_10, %c0_11], %14 {strides = array<i32>} : memref<1x16x128xf32, #tpu.memory_space<vmem>>, vector<1x16x128xf32>,
    return
  }
  func.func @transform_0(%arg0: i32) -> (i32, i32, i32) {
    %c0_i32 = arith.constant 0 : i32
    %c0_i32_0 = arith.constant 0 : i32
    %c0_i32_1 = arith.constant 0 : i32
    return %arg0, %c0_i32, %c0_i32_0 : i32, i32, i32
  }
  func.func @transform_1(%arg0: i32) -> (i32, i32) {
    %c0_i32 = arith.constant 0 : i32
    %c0_i32_0 = arith.constant 0 : i32
    %c0_i32_1 = arith.constant 0 : i32
    return %c0_i32, %c0_i32_0 : i32, i32
  }
  func.func @transform_2(%arg0: i32) -> (i32, i32) {
    %c0_i32 = arith.constant 0 : i32
    %c0_i32_0 = arith.constant 0 : i32
    %c0_i32_1 = arith.constant 0 : i32
    return %c0_i32, %c0_i32_0 : i32, i32
  }
  func.func @transform_3(%arg0: i32) -> (i32, i32, i32) {
    %c0_i32 = arith.constant 0 : i32
    %c0_i32_0 = arith.constant 0 : i32
    %c0_i32_1 = arith.constant 0 : i32
    return %arg0, %c0_i32, %c0_i32_0 : i32, i32, i32
  }
  func.func @transform_4(%arg0: i32) -> (i32, i32, i32) {
    %c0_i32 = arith.constant 0 : i32
    %c0_i32_0 = arith.constant 0 : i32
    %c0_i32_1 = arith.constant 0 : i32
    return %arg0, %c0_i32, %c0_i32_0 : i32, i32, i32
  }
}

</mosaic_0001>

<bundles_post_ra>
// kernel: tpu_custom_call.1
= control target key start
LH: loop header
LB: loop body
LE: loop exit
PB: predicated region body
PF: predicated region fallthrough
CT: control target
= control target key end

     0   :  { %10 = vsyncpa [#allocation3], 0  ;;  %s1049_s0 = inlined_call_operand.hbm [shape: f32[2,16,128], index: 0, kind: input, shape index: {}]   ;;  %s1050_s1 = inlined_call_operand.hbm [shape: f32[128,256], index: 1, kind: input, shape index: {}]   ;;  %s1051_s2 = inlined_call_operand.hbm [shape: f32[1,256], index: 2, kind: input, shape index: {}]   ;;  %s1052_s3 = inlined_call_operand.hbm [shape: f32[2,16,128], index: 3, kind: output, shape index: {0}]   ;;  %s1053_s4 = inlined_call_operand.hbm [shape: f32[2,16,128], index: 4, kind: output, shape index: {1}]  }
   0x1   :  { %12 = vsyncpa [#allocation3 + $0x1], 0 }
   0x2   :  { %13 = vsyncpa [#allocation6], 0 }
   0x3   :  { %14 = vsyncpa [#allocation4], 0 }
   0x4   :  { %16 = vsyncpa [#allocation4 + $0x1], 0 }
   0x5   :  { %17 = vsyncpa [#allocation10], 0 }
   0x6   :  { %19 = vsyncpa [#allocation10 + $0x1], 0  ;;  %s875_s15 = smov 0   ;;  %s877_s16 = smov 0  }
   0x7   :  { %s879_s17 = smov 0   ;;  %s881_s18 = smov 0  }
   0x8 LB: > { %s896_s19 = sadd.s32 4294967295, %s840_s18   ;;  %s513_s20 = sadd.s32 4294967294, %s840_s18   ;;  %s840_s18 = sphi %s881_s18, %s1063_s18   ;;  %s836_s17 = sphi %s879_s17, %s1062_s17   ;;  %s832_s16 = sphi %s877_s16, %s1061_s16   ;;  %s828_s15 = sphi %s875_s15, %s1060_s15  }
   0x9   : > { %p45_p0 = scmp.ne.s32.totalorder %s832_s16, %s828_s15  ;;  %p46_p1 = scmp.eq.s32.totalorder %s896_s19, 0 }
   0xa   : > { %p111_p2 = scmp.eq.s32.totalorder %s896_s19, 1  ;;  %p117_p3 = scmp.eq.s32.totalorder %s513_s20, 1 }
   0xb   : > { %p905_p4 = por %p46_p1, %p45_p0  ;;  %p514_p5 = scmp.ge.s32.totalorder %s840_s18, 1 }
   0xc   : > { %p910_p6 = por %p117_p3, %p45_p0  ;;  %p150_p7 = scmp.lt.s32.totalorder %s840_s18, 3 }
   0xd   : > { %s161_s25 = sshll.u32 %s1050_s1, 4  ;;  %s842_s27 = smov [#allocation5]   ;;  %s162_s25 = int_to_ptr.hbm [resolvable:$true] %s161_s25 }
   0xe   : > { %p918_p8 = pnand %p514_p5, %p150_p7  ;;  %s163_s28 = sshll.u32 %s842_s27, 4  ;;  %s164_s28 = int_to_ptr.vmem [resolvable:$true] %s163_s28 }
   0xf   : > { %s176_s5 = sshll.u32 %s1051_s2, 4  ;;  %s843_s6 = smov 256   ;;  %s177_s5 = int_to_ptr.hbm [resolvable:$true] %s176_s5 }
  0x10   : > { %p584_p9 = pneg %p918_p8  ;;  %s844_s7 = smov 16  }
  0x11   : > { %s845_s8 = smov [#allocation7]   ;;  %s931_s10 = sadd.s32 1, %s840_s18  }
  0x12   : > { %p585_p10 = pnand %p584_p9, %p46_p1  ;;  %s178_s9 = sshll.u32 %s845_s8, 4  ;;  %s179_s9 = int_to_ptr.vmem [resolvable:$true] %s178_s9 }
  0x13   : > { %s32_s11 = sadd.s32 1, %s836_s17  ;;  %s29_s12 = ssub.s32 %s840_s18, %s931_s10 }
  0x14   : > { %587 = dma.hbm_to_vmem [thread:$0]  (!%p585_p10), %s162_s25, 4096, %s164_s28, [#allocation6], %s843_s6, %s843_s6, %s844_s7  }
  0x15   : > { %590 = dma.hbm_to_vmem [thread:$0]  (!%p585_p10), %s177_s5, 32, %s179_s9, [#allocation6]  }
  0x16   : > { %p39_p12 = scmp.ne.s32.totalorder %s836_s17, %s832_s16  ;;  %p30_p13 = scmp.eq.s32.totalorder %s29_s12, 0 }
  0x17   : > { %p40_p0 = scmp.eq.s32.totalorder %s840_s18, 0  ;;  %p604_p5 = scmp.lt.s32.totalorder %s840_s18, 2 }
  0x18   : > { %p941_p3 = por %p111_p2, %p39_p12  ;;  %s189_s20 = sand.u32 1, %s836_s17  }
  0x19   : > { %s947_s14 = scalar_select %p30_p13, %s836_s17, %s32_s11  }
  0x1a   : > { %p41_p7 = por %p40_p0, %p39_p12  ;;  %s518_s23 = sshll.u32 %s189_s20, 4 }
  0x1b   : > { %s535_s24 = sshll.u32 %s840_s18, 4  ;;  %s193_s29 = scalar_lea.vmem [#allocation2], %s518_s23 }
  0x1c   : > { %s198_s28 = scalar_lea.hbm %s1049_s0, %s535_s24  ;;  %s201_s30 = sshll.u32 %s193_s29, 4  ;;  %s202_s30 = int_to_ptr.vmem [resolvable:$true] %s201_s30 }
  0x1d   : > { %s199_s5 = sshll.u32 %s198_s28, 4  ;;  %p954_p2 = pnand %p604_p5, %p41_p7  ;;  %s200_s5 = int_to_ptr.hbm [resolvable:$true] %s199_s5 }
  0x1e   : > { %s190_s7 = scalar_lea.sflag [#allocation3], %s189_s20  ;;  %s708_s8 = sshra.s32 %s200_s5, 4  ;;  %s709_s8 = int_to_ptr.hbm [resolvable:$true] %s708_s8 }
  0x1f   : > { %s710_s9 = scalar_lea.hbm %s709_s8, 16  ;;  %p712_p10 = pneg %p954_p2 }
  0x20   : > { %p711_p9 = scmp.ne.s32.totalorder %s709_s8, %s710_s9  ;;  %s715_s23 = scalar_lea.hbm %s1049_s0, 32 }
  0x21   : > { %p716_p0 = scmp.lt.s32.totalorder %s709_s8, %s1049_s0  ;;  %p717_p5 = scmp.lt.s32.totalorder %s715_s23, %s710_s9 }
  0x22   : > { %p713_p12 = pnand %p712_p10, %p711_p9 }
  0x23   : > { %p718_p7 = por %p717_p5, %p716_p0 }
  0x24   : > { %p714_p13 = pneg %p713_p12 }
  0x26   : > { %p719_p11 = pnand %p718_p7, %p714_p13 }
  0x28   : > { %722 = shalt.err (!%p719_p11)
}
  0x29   : > { %s846_s20 = smov 128   ;;  %s847_s27 = smov 8  }
  0x2a   : > { %594 = dma.hbm_to_vmem [thread:$0]  (!%p954_p2), %s200_s5, 256, %s202_s30, %s190_s7, %s846_s20, %s846_s20, %s847_s27  }
  0x2b   : > { %213 = sbr.rel (%p918_p8) target bundleno = 234 (0xea), region = 32  ;;  %s971_s28 = sand.u32 (!%p918_p8), 1, %s832_s16  }
  0x2c   : > { %s974_s29 = sshll.u32 (!%p918_p8), %s971_s28, 4  ;;  %s216_s8 = scalar_lea.sflag (!%p918_p8), [#allocation3], %s971_s28 }
  0x2d   : > { %s219_s9 = scalar_lea.vmem (!%p918_p8), [#allocation2], %s974_s29 }
  0x30   : > { %811 = dma.done.wait (%p905_p4), %s216_s8, 256  }
  0x31   : > { %813 = vsyncadd (%p905_p4), %s216_s8, 4294967040 }
  0x32   : > { %815 = dma.done.wait (%p46_p1), [#allocation6], 4128  }
  0x33   : > { %817 = vsyncadd (%p46_p1), [#allocation6], 4294963168  ;;  %v292_v0 = vld [vmem:[#allocation5 + $0xf0] sm:$0xff]  ;;  %v293_v1 = vld [vmem:[#allocation5 + $0xf8] sm:$0xff]  ;;  %s536_s21 = sshll.u32 %s896_s19, 4  ;;  %s252_s6 = scalar_lea.vmem [#allocation8], %s974_s29 }
  0x34   : > { %v290_v2 = vld [vmem:[#allocation5 + $0xe0] sm:$0xff]  ;;  %538 = vmatpush.msra.mxu2 %v292_v0  ;;  %554 = vmatpush.msra.mxu3 %v293_v1  ;;  %v291_v3 = vld [vmem:[#allocation5 + $0xe8] sm:$0xff]  ;;  %v288_v4 = vld [vmem:[#allocation5 + $0xd0] sm:$0xff]  ;;  %s367_s5 = scalar_lea.hbm %s1052_s3, %s536_s21  ;;  %s368_s7 = sshll.u32 %s252_s6, 4  ;;  %s999_s7 = int_to_ptr.vmem [resolvable:$true] %s368_s7 }
  0x35   : > { %v289_v5 = vld [vmem:[#allocation5 + $0xd8] sm:$0xff]  ;;  %300 = vmatpush.msra.mxu0 %v292_v0  ;;  %323 = vmatpush.msra.mxu1 %v293_v1  ;;  %v286_v6 = vld [vmem:[#allocation5 + $0xc0] sm:$0xff]  ;;  %v287_v7 = vld [vmem:[#allocation5 + $0xc8] sm:$0xff]  ;;  %s259_s11 = scalar_lea.vmem [#allocation9], %s974_s29  ;;  %s384_s25 = scalar_lea.hbm %s1053_s4, %s536_s21 }
  0x36   : > { %539 = vmatpush.msra.mxu2 %v290_v2  ;;  %555 = vmatpush.msra.mxu3 %v291_v3  ;;  %v284_v8 = vld [vmem:[#allocation5 + $0xb0] sm:$0xff]  ;;  %v285_v9 = vld [vmem:[#allocation5 + $0xb8] sm:$0xff]  ;;  %v282_v10 = vld [vmem:[#allocation5 + $0xa0] sm:$0xff]  ;;  %s385_s12 = sshll.u32 %s259_s11, 4  ;;  %s370_s19 = sshll.u32 %s367_s5, 4  ;;  %s1001_s12 = int_to_ptr.vmem [resolvable:$true] %s385_s12  ;;  %s371_s19 = int_to_ptr.hbm [resolvable:$true] %s370_s19 }
  0x37   : > { %301 = vmatpush.msra.mxu0 %v290_v2  ;;  %324 = vmatpush.msra.mxu1 %v291_v3  ;;  %v283_v11 = vld [vmem:[#allocation5 + $0xa8] sm:$0xff]  ;;  %v280_v12 = vld [vmem:[#allocation5 + $0x90] sm:$0xff]  ;;  %v281_v13 = vld [vmem:[#allocation5 + $0x98] sm:$0xff]  ;;  %s387_s20 = sshll.u32 %s384_s25, 4  ;;  %s351_s27 = scalar_lea.sflag [#allocation4], %s971_s28  ;;  %s1003_s20 = int_to_ptr.hbm [resolvable:$true] %s387_s20 }
  0x38   : > { %540 = vmatpush.msra.mxu2 %v288_v4  ;;  %556 = vmatpush.msra.mxu3 %v289_v5  ;;  %v278_v14 = vld [vmem:[#allocation5 + $0x80] sm:$0xff]  ;;  %v279_v15 = vld [vmem:[#allocation5 + $0x88] sm:$0xff]  ;;  %v276_v16 = vld [vmem:[#allocation5 + $0x70] sm:$0xff]  ;;  %s752_s29 = sshra.s32 %s371_s19, 4  ;;  %s758_s26 = scalar_lea.hbm %s1052_s3, 32  ;;  %s753_s29 = int_to_ptr.hbm [resolvable:$true] %s752_s29 }
  0x39   : > { %302 = vmatpush.msra.mxu0 %v288_v4  ;;  %325 = vmatpush.msra.mxu1 %v289_v5  ;;  %v277_v17 = vld [vmem:[#allocation5 + $0x78] sm:$0xff]  ;;  %v274_v18 = vld [vmem:[#allocation5 + $0x60] sm:$0xff]  ;;  %v275_v19 = vld [vmem:[#allocation5 + $0x68] sm:$0xff]  ;;  %s754_s8 = scalar_lea.hbm %s753_s29, 16  ;;  %p759_p11 = scmp.lt.s32.totalorder %s753_s29, %s1052_s3 }
  0x3a   : > { %541 = vmatpush.msra.mxu2 %v286_v6  ;;  %557 = vmatpush.msra.mxu3 %v287_v7  ;;  %v272_v20 = vld [vmem:[#allocation5 + $0x50] sm:$0xff]  ;;  %v273_v21 = vld [vmem:[#allocation5 + $0x58] sm:$0xff]  ;;  %v270_v22 = vld [vmem:[#allocation5 + $0x40] sm:$0xff]  ;;  %p755_p1 = scmp.ne.s32.totalorder %s753_s29, %s754_s8  ;;  %p760_p2 = scmp.lt.s32.totalorder %s758_s26, %s754_s8 }
  0x3b   : > { %303 = vmatpush.msra.mxu0 %v286_v6  ;;  %326 = vmatpush.msra.mxu1 %v287_v7  ;;  %v271_v23 = vld [vmem:[#allocation5 + $0x48] sm:$0xff]  ;;  %v268_v24 = vld [vmem:[#allocation5 + $0x30] sm:$0xff]  ;;  %v269_v25 = vld [vmem:[#allocation5 + $0x38] sm:$0xff] }
  0x3c   : > { %542 = vmatpush.msra.mxu2 %v284_v8  ;;  %558 = vmatpush.msra.mxu3 %v285_v9  ;;  %v266_v26 = vld [vmem:[#allocation5 + $0x20] sm:$0xff]  ;;  %v267_v27 = vld [vmem:[#allocation5 + $0x28] sm:$0xff]  ;;  %v264_v28 = vld [vmem:[#allocation5 + $0x10] sm:$0xff]  ;;  %p756_p4 = pnand %p755_p1, %p941_p3  ;;  %p761_p9 = por %p760_p2, %p759_p11 }
  0x3d   : > { %304 = vmatpush.msra.mxu0 %v284_v8  ;;  %327 = vmatpush.msra.mxu1 %v285_v9  ;;  %v265_v29 = vld [vmem:[#allocation5 + $0x18] sm:$0xff]  ;;  %v262_v30 = vld [vmem:[#allocation5] sm:$0xff]  ;;  %v263_v31 = vld [vmem:[#allocation5 + $0x8] sm:$0xff] }
  0x3e   : > { %543 = vmatpush.msra.mxu2 %v282_v10  ;;  %559 = vmatpush.msra.mxu3 %v283_v11  ;;  %v261_v32 = vld [vmem:[%s219_s9 + $0x8] sm:$0xff]  ;;  %v260_v33 = vld [vmem:[%s219_s9] sm:$0xff]  ;;  %p757_p8 = pneg %p756_p4 }
  0x3f   : > { %305 = vmatpush.msra.mxu0 %v282_v10  ;;  %328 = vmatpush.msra.mxu1 %v283_v11  ;;  %v294_v34 = vld [vmem:[#allocation7] sm:$0x3] }
  0x40   : > { %544 = vmatpush.msra.mxu2 %v280_v12  ;;  %560 = vmatpush.msra.mxu3 %v281_v13  ;;  %v296_v35 = vperm.slane %v294_v34, 0  ;;  %v297_v36 = vperm.slane %v294_v34, 1  ;;  %p762_p10 = pnand %p761_p9, %p757_p8 }
  0x41   : > { %306 = vmatpush.msra.mxu0 %v280_v12  ;;  %329 = vmatpush.msra.mxu1 %v281_v13 }
  0x42   : > { %545 = vmatpush.msra.mxu2 %v278_v14  ;;  %561 = vmatpush.msra.mxu3 %v279_v15 }
  0x43   : > { %307 = vmatpush.msra.mxu0 %v278_v14  ;;  %330 = vmatpush.msra.mxu1 %v279_v15 }
  0x44   : > { %546 = vmatpush.msra.mxu2 %v276_v16  ;;  %562 = vmatpush.msra.mxu3 %v277_v17 }
  0x45   : > { %308 = vmatpush.msra.mxu0 %v276_v16  ;;  %331 = vmatpush.msra.mxu1 %v277_v17 }
  0x46   : > { %547 = vmatpush.msra.mxu2 %v274_v18  ;;  %563 = vmatpush.msra.mxu3 %v275_v19 }
  0x47   : > { %309 = vmatpush.msra.mxu0 %v274_v18  ;;  %332 = vmatpush.msra.mxu1 %v275_v19 }
  0x48   : > { %548 = vmatpush.msra.mxu2 %v272_v20  ;;  %564 = vmatpush.msra.mxu3 %v273_v21 }
  0x49   : > { %310 = vmatpush.msra.mxu0 %v272_v20  ;;  %333 = vmatpush.msra.mxu1 %v273_v21 }
  0x4a   : > { %549 = vmatpush.msra.mxu2 %v270_v22  ;;  %565 = vmatpush.msra.mxu3 %v271_v23 }
  0x4b   : > { %311 = vmatpush.msra.mxu0 %v270_v22  ;;  %334 = vmatpush.msra.mxu1 %v271_v23 }
  0x4c   : > { %550 = vmatpush.msra.mxu2 %v268_v24  ;;  %566 = vmatpush.msra.mxu3 %v269_v25 }
  0x4d   : > { %312 = vmatpush.msra.mxu0 %v268_v24  ;;  %335 = vmatpush.msra.mxu1 %v269_v25 }
  0x4e   : > { %551 = vmatpush.msra.mxu2 %v266_v26  ;;  %567 = vmatpush.msra.mxu3 %v267_v27 }
  0x4f   : > { %313 = vmatpush.msra.mxu0 %v266_v26  ;;  %336 = vmatpush.msra.mxu1 %v267_v27 }
  0x50   : > { %552 = vmatpush.msra.mxu2 %v264_v28  ;;  %568 = vmatpush.msra.mxu3 %v265_v29 }
  0x51   : > { %314 = vmatpush.msra.mxu0 %v264_v28  ;;  %337 = vmatpush.msra.mxu1 %v265_v29 }
  0x52   : > { %553 = vmatpush.msra.mxu2 %v262_v30  ;;  %569 = vmatpush.msra.mxu3 %v263_v31 }
  0x53   : > { %319 = vmatmul.f32.vlgmr.msra.gmra.mxu2 %v261_v32  ;;  %342 = vmatmul.f32.vlgmr.msra.gmra.mxu3 %v261_v32 }
  0x54   : > { %315 = vmatpush.msra.mxu0 %v262_v30  ;;  %338 = vmatpush.msra.mxu1 %v263_v31 }
  0x55   : > { %316 = vmatmul.f32.vlgmr.msra.gmra.mxu0 %v260_v33  ;;  %339 = vmatmul.f32.vlgmr.msra.gmra.mxu1 %v260_v33 }
  0xd2   : > { %v317_v37 = vpop.f32.mrf.mxu0  ;;  %v340_v38 = vpop.f32.mrf.mxu1 }
  0xd3   : > { %v318_v39 = vadd.f32 %v317_v37, %v296_v35  ;;  %v341_v40 = vadd.f32 %v340_v38, %v297_v36 }
  0xd5   : > { %346 = vst [vmem:[%s252_s6] sm:$0xff] %v318_v39 }
  0xd6   : > { %v320_v41 = vpop.f32.mrf.mxu2  ;;  %348 = vst [vmem:[%s259_s11] sm:$0xff] %v341_v40  ;;  %v343_v42 = vpop.f32.mrf.mxu3 }
  0xd7   : > { %v321_v43 = vadd.f32 %v320_v41, %v296_v35  ;;  %v344_v44 = vadd.f32 %v343_v42, %v297_v36 }
  0xd9   : > { %347 = vst [vmem:[%s252_s6 + $0x8] sm:$0xff] %v321_v43 }
  0xda   : > { %349 = vst [vmem:[%s259_s11 + $0x8] sm:$0xff] %v344_v44 }
  0xdb   : > { %765 = shalt.err (!%p762_p10)
}
  0xdc   : > { %s848_s6 = smov 128   ;;  %s849_s11 = smov 8  }
  0xdd   : > { %580 = dma.vmem_to_hbm [thread:$0]  (%p941_p3), %s999_s7, 256, %s371_s19, %s351_s27, %s848_s6, %s848_s6, %s849_s11  }
  0xde   : > { %s356_s23 = scalar_lea.sflag [#allocation10], %s971_s28  ;;  %s780_s24 = sshra.s32 %s1003_s20, 4  ;;  %s781_s24 = int_to_ptr.hbm [resolvable:$true] %s780_s24 }
  0xdf   : > { %s782_s25 = scalar_lea.hbm %s781_s24, 16  ;;  %s786_s9 = scalar_lea.hbm %s1053_s4, 32 }
  0xe0   : > { %p783_p12 = scmp.ne.s32.totalorder %s781_s24, %s782_s25  ;;  %p787_p5 = scmp.lt.s32.totalorder %s781_s24, %s1053_s4 }
  0xe1   : > { %p788_p7 = scmp.lt.s32.totalorder %s786_s9, %s782_s25 }
  0xe2   : > { %p784_p13 = pnand %p783_p12, %p941_p3 }
  0xe3   : > { %p789_p1 = por %p788_p7, %p787_p5 }
  0xe4   : > { %p785_p0 = pneg %p784_p13 }
  0xe6   : > { %p790_p4 = pnand %p789_p1, %p785_p0 }
  0xe8   : > { %793 = shalt.err (!%p790_p4)
}
  0xe9   : > { %581 = dma.vmem_to_hbm [thread:$0]  (%p941_p3), %s1001_s12, 256, %s1003_s20, %s356_s23, %s848_s6, %s848_s6, %s849_s11  }
  0xea PF: > { %s402_s28 = sand.u32 1, %s828_s15   ;;  %p1059_p8 = scmp.ge.s32.totalorder %s840_s18, 2 }
  0xeb   : > { %s403_s7 = scalar_lea.sflag [#allocation4], %s402_s28 }
  0xec   : > { %p596_p11 = pnand %p1059_p8, %p910_p6 }
  0xee   : > { %p597_p2 = pneg %p596_p11 }
  0xf0   : > { %819 = dma.done.wait (%p597_p2), %s403_s7, 256  }
  0xf1   : > { %821 = vsyncadd (%p597_p2), %s403_s7, 4294967040  ;;  %s413_s19 = scalar_lea.sflag [#allocation10], %s402_s28 }
  0xf2   : > { %823 = dma.done.wait (%p597_p2), %s413_s19, 256  }
  0xf3   : > { %825 = vsyncadd (%p597_p2), %s413_s19, 4294967040  ;;  %p22_p3 = scmp.ge.s32.totalorder %s931_s10, 4   ;;  %s1060_s15 = smov %s832_s16 }
  0xf4   : > { %s1061_s16 = smov %s836_s17  ;;  %s1062_s17 = smov %s947_s14 }
  0xf5   : > { %s1063_s18 = smov %s931_s10  ;;  %24 = sbr.rel (!%p22_p3) target bundleno = 8 (0x8), region = 102 }
  0xfa   :  { %419 = vsyncpa [#allocation3], 1 }
  0xfb   :  { %421 = vsyncpa [#allocation3 + $0x1], 1 }
  0xfc   :  { %422 = vsyncpa [#allocation6], 1 }
  0xfd   :  { %423 = vsyncpa [#allocation4], 1 }
  0xfe   :  { %425 = vsyncpa [#allocation4 + $0x1], 1 }
  0xff   :  { %426 = vsyncpa [#allocation10], 1 }
 0x100   :  { %428 = vsyncpa [#allocation10 + $0x1], 1 }

</bundles_post_ra>
